<compile_context>
chip_gen: v5e
topology: v5e:2x2
jax: 0.10.0
libtpu: 0.0.40
codegen_flags: <defaults>
</compile_context>

<pallas_src>
import functools

import jax
import jax.numpy as jnp
from jax import lax
from jax.experimental import pallas as pl
from jax.experimental.pallas import tpu as pltpu


# --------------------------------------------------------------------------
# Fused kernel:  x tile -> z -> VQ choose -> z_q -> decoded tile
# Everything is laid out with pixels on the lane (last) axis.
#   x       : (C, TP)     image pixels                              (tiled)
#   w_in_t  : (D, C)      folded encoder+quant_conv weight^T        (resident)
#   b_in    : (D, 1)      folded encoder+quant_conv bias            (resident)
#   e       : (K, D)      codebook                                  (resident)
#   e_sq    : (K, 1)      ||e_k||^2 (hoisted)                       (resident)
#   w_out_t : (Cout, D)   folded post_quant_conv+decoder weight^T   (resident)
#   b_out   : (Cout, 1)   folded post_quant_conv+decoder bias       (resident)
# Outputs (all lane-dense):
#   dec     : (Cout, TP)  decoded pixels
#   idx     : (1, TP)     codebook indices
#   sse     : (1, TP)     per-pixel sum((z_q - z)^2), padded pixels zeroed
# --------------------------------------------------------------------------
def _choose_fused_kernel(x_ref, w_in_t_ref, b_in_ref, e_ref, esq_ref,
                         w_out_t_ref, b_out_ref,
                         dec_ref, idx_ref, sse_ref, *, total_p, tile_p):
    x = x_ref[...]                                                    # (C, TP)

    # ---- fused encoder + quant_conv (1x1 convs compose exactly) ----
    z = jnp.dot(w_in_t_ref[...], x,
                preferred_element_type=jnp.float32) + b_in_ref[...]  # (D, TP)

    # ---- ChooseNet: nearest-codebook selection ----
    #   dist[k, p] = ||z_p||^2 - 2 <z_p, e_k> + ||e_k||^2
    z_sq = jnp.sum(z * z, axis=0, keepdims=True)                      # (1, TP)
    dots = jnp.dot(e_ref[...], z,
                   preferred_element_type=jnp.float32)                # (K, TP)
    dist = z_sq - 2.0 * dots + esq_ref[...]                           # (K, TP)

    # argmin along the codebook (sublane) axis; ties -> smallest index
    # (torch.argmin semantics)
    K = dist.shape[0]
    min_d = jnp.min(dist, axis=0, keepdims=True)                      # (1, TP)
    k_iota = lax.broadcasted_iota(jnp.int32, dist.shape, 0)           # (K, TP)
    idx = jnp.min(jnp.where(dist == min_d, k_iota, K),
                  axis=0, keepdims=True).astype(jnp.int32)            # (1, TP)
    idx_ref[...] = idx

    # ---- codebook.embedding lookup as one-hot matmul (exact row select) ----
    onehot = (k_iota == idx).astype(jnp.float32)                      # (K, TP)
    z_q = lax.dot_general(e_ref[...], onehot,                         # e^T @ 1h
                          dimension_numbers=(((0,), (0,)), ((), ())),
                          preferred_element_type=jnp.float32)         # (D, TP)

    # ---- q_loss pieces: per-pixel SSE.  min_d IS ||z_p - e_idx||^2 in the
    #      same arithmetic (clamp tiny negative cancellation, mask pad rows).
    lane = lax.broadcasted_iota(jnp.int32, (1, tile_p), 1)
    valid = (pl.program_id(0) * tile_p + lane) < total_p
    sse_ref[...] = jnp.where(valid, jnp.maximum(min_d, 0.0), 0.0)     # (1, TP)

    # ---- straight-through (forward value == z_q), then fused
    #      post_quant_conv + decoder ----
    dec = jnp.dot(w_out_t_ref[...], z_q,
                  preferred_element_type=jnp.float32) + b_out_ref[...]
    dec_ref[...] = dec.astype(dec_ref.dtype)                          # (Co, TP)


def choose_pallas(x_cp, w_in, b_in, e, w_out, b_out, *, tile_p=256):
    """x_cp: (C, P) with pixels on the last axis.
    Returns (decoded (Cout, P), indices (P,), sse scalar)."""
    C, P = x_cp.shape
    D = w_in.shape[1]
    K = e.shape[0]
    Cout = w_out.shape[1]
    assert tile_p % 128 == 0, "tile_p must be a multiple of 128 (lane-dense)"

    num_tiles = pl.cdiv(P, tile_p)
    P_pad = num_tiles * tile_p
    if P_pad != P:                       # guard ragged P (padded pixels masked)
        x_cp = jnp.pad(x_cp, ((0, 0), (0, P_pad - P)))

    # Hoisted transposes / precomputes (tiny, once, resident across the grid).
    w_in_t = w_in.T                                    # (D, C)
    b_in2 = b_in.reshape(D, 1)
    esq = jnp.sum(e * e, axis=1, keepdims=True)        # (K, 1)
    w_out_t = w_out.T                                  # (Cout, D)
    b_out2 = b_out.reshape(Cout, 1)

    kernel = functools.partial(_choose_fused_kernel, total_p=P, tile_p=tile_p)

    dec, idx, row_sse = pl.pallas_call(
        kernel,
        out_shape=(
            jax.ShapeDtypeStruct((Cout, P_pad), jnp.float32),
            jax.ShapeDtypeStruct((1, P_pad), jnp.int32),
            jax.ShapeDtypeStruct((1, P_pad), jnp.float32),
        ),
        grid_spec=pltpu.PrefetchScalarGridSpec(
            num_scalar_prefetch=0,
            grid=(num_tiles,),
            in_specs=[
                pl.BlockSpec((C, tile_p), lambda i: (0, i)),    # x tile
                pl.BlockSpec((D, C), lambda i: (0, 0)),         # w_in^T (res.)
                pl.BlockSpec((D, 1), lambda i: (0, 0)),         # b_in
                pl.BlockSpec((K, D), lambda i: (0, 0)),         # codebook
                pl.BlockSpec((K, 1), lambda i: (0, 0)),         # ||e||^2
                pl.BlockSpec((Cout, D), lambda i: (0, 0)),      # w_out^T
                pl.BlockSpec((Cout, 1), lambda i: (0, 0)),      # b_out
            ],
            out_specs=(
                pl.BlockSpec((Cout, tile_p), lambda i: (0, i)),  # dec (dense)
                pl.BlockSpec((1, tile_p), lambda i: (0, i)),     # idx (dense)
                pl.BlockSpec((1, tile_p), lambda i: (0, i)),     # sse (dense)
            ),
        ),
        compiler_params=pltpu.CompilerParams(
            dimension_semantics=("parallel",)),                  # no carried acc
    )(x_cp, w_in_t, b_in2, e, esq, w_out_t, b_out2)

    dec = dec[:, :P]
    indices = idx.reshape(-1)[:P]
    sse = jnp.sum(row_sse)               # padded lanes already zeroed in-kernel
    return dec, indices, sse


# --------------------------------------------------------------------------
# Parameters (deterministic, synthetic — no checkpoint load).
# --------------------------------------------------------------------------
def init_params(key, *, img_ch, latent_dim, num_codebook):
    ks = jax.random.split(key, 9)
    s = 0.1
    return {
        "enc_w":  s * jax.random.normal(ks[0], (img_ch, latent_dim), jnp.float32),
        "enc_b":  s * jax.random.normal(ks[1], (latent_dim,), jnp.float32),
        "quant_w": s * jax.random.normal(ks[2], (latent_dim, latent_dim), jnp.float32),
        "quant_b": s * jax.random.normal(ks[3], (latent_dim,), jnp.float32),
        "codebook": jax.random.normal(ks[4], (num_codebook, latent_dim), jnp.float32),
        "postq_w": s * jax.random.normal(ks[5], (latent_dim, latent_dim), jnp.float32),
        "postq_b": s * jax.random.normal(ks[6], (latent_dim,), jnp.float32),
        "dec_w":  s * jax.random.normal(ks[7], (latent_dim, img_ch), jnp.float32),
        "dec_b":  s * jax.random.normal(ks[8], (img_ch,), jnp.float32),
    }


def fold_params(params):
    """Algebraically collapse the 1x1-conv chains (exact composition):
       encoder + quant_conv  -> one (C, D) matmul
       post_quant + decoder  -> one (D, C) matmul."""
    return {
        "w_in":  params["enc_w"] @ params["quant_w"],
        "b_in":  params["enc_b"] @ params["quant_w"] + params["quant_b"],
        "e":     params["codebook"],
        "w_out": params["postq_w"] @ params["dec_w"],
        "b_out": params["postq_b"] @ params["dec_w"] + params["dec_b"],
    }


# --------------------------------------------------------------------------
# Forward pass (mirrors Choose.forward).
# --------------------------------------------------------------------------
@functools.partial(jax.jit, static_argnames=("beta", "tile_p"))
def choose_forward(folded, imgs_nchw, *, beta=0.25, tile_p=256):
    N, C, H, W = imgs_nchw.shape
    P = N * H * W

    # NCHW -> (C, P): pixels land on the lane axis (layout glue only).
    x_cp = jnp.transpose(imgs_nchw, (1, 0, 2, 3)).reshape(C, P)

    dec_cp, indices, sse = choose_pallas(
        x_cp, folded["w_in"], folded["b_in"], folded["e"],
        folded["w_out"], folded["b_out"], tile_p=tile_p)

    D = folded["w_in"].shape[1]
    mse = sse / (P * D)
    # q_loss = mean((zq.detach()-z)^2) + beta*mean((zq-z.detach())^2)
    # forward *value* of both terms is identical -> (1+beta)*mse
    q_loss = (1.0 + beta) * mse

    Cout = dec_cp.shape[0]
    decoded = jnp.transpose(dec_cp.reshape(Cout, N, H, W), (0, 1, 2, 3)[0:0] or (1, 0, 2, 3))
    return decoded, indices, q_loss


# --------------------------------------------------------------------------
# Plain-JAX reference for sanity checking (same folded weights; the fold is
# exact algebra, so this mirrors encoder->quant_conv->VQ->post_quant->decoder).
# --------------------------------------------------------------------------
def reference_forward(folded, imgs_nchw, *, beta=0.25):
    N, C, H, W = imgs_nchw.shape
    P = N * H * W
    x = jnp.transpose(imgs_nchw, (0, 2, 3, 1)).reshape(P, C)
    z = x @ folded["w_in"] + folded["b_in"]
    e = folded["e"]
    dist = (jnp.sum(z * z, 1, keepdims=True) - 2 * z @ e.T
            + jnp.sum(e * e, 1)[None])
    idx = jnp.argmin(dist, axis=1).astype(jnp.int32)
    z_q = e[idx]
    q_loss = (1.0 + beta) * jnp.mean((z_q - z) ** 2)
    dec = z_q @ folded["w_out"] + folded["b_out"]
    Cout = dec.shape[1]
    decoded = jnp.transpose(dec.reshape(N, H, W, Cout), (0, 3, 1, 2))
    return decoded, idx, q_loss


if __name__ == "__main__":
    # Small shapes: batch=2, image channels=3, spatial=16x16,
    # latent_dim=32, num_codebook_vectors=128, beta=0.25.  P = 512 -> grid=(2,).
    key = jax.random.PRNGKey(0)
    k_params, k_imgs = jax.random.split(key)

    img_ch, latent_dim, num_codebook = 3, 32, 128
    params = init_params(k_params, img_ch=img_ch, latent_dim=latent_dim,
                         num_codebook=num_codebook)
    folded = fold_params(params)
    imgs = jax.random.normal(k_imgs, (2, img_ch, 16, 16), jnp.float32)  # NCHW

    decoded, indices, q_loss = choose_forward(folded, imgs, beta=0.25)
    jax.block_until_ready((decoded, indices, q_loss))

    ref_dec, ref_idx, ref_loss = reference_forward(folded, imgs, beta=0.25)
    assert decoded.shape == imgs.shape and decoded.dtype == jnp.float32
    assert indices.shape == (imgs.shape[0] * 16 * 16,) and indices.dtype == jnp.int32
    assert bool(jnp.all(indices == ref_idx))
    assert float(jnp.max(jnp.abs(decoded - ref_dec))) < 1e-4
    assert abs(float(q_loss) - float(ref_loss)) < 1e-4 * max(1.0, abs(float(ref_loss)))

    print("KERNEL_OK")
</pallas_src>

<mosaic_0001>
module attributes {stable_mosaic.version = 11 : i64} {
  func.func @_choose_fused_kernel(%arg0: i32, %arg1: memref<3x256xf32, #tpu.memory_space<vmem>>, %arg2: memref<32x3xf32, #tpu.memory_space<vmem>>, %arg3: memref<32x1xf32, #tpu.memory_space<vmem>>, %arg4: memref<128x32xf32, #tpu.memory_space<vmem>>, %arg5: memref<128x1xf32, #tpu.memory_space<vmem>>, %arg6: memref<3x32xf32, #tpu.memory_space<vmem>>, %arg7: memref<3x1xf32, #tpu.memory_space<vmem>>, %arg8: memref<3x256xf32, #tpu.memory_space<vmem>>, %arg9: memref<1x256xi32, #tpu.memory_space<vmem>>, %arg10: memref<1x256xf32, #tpu.memory_space<vmem>>) attributes {dimension_semantics = [#tpu.dimension_semantics<parallel>], iteration_bounds = array<i64: 2>, scalar_prefetch = 0 : i64, scratch_operands = 0 : i64, tpu.core_type = #tpu.core_type<tc>, window_params = [{transform_indices = @transform_0, window_bounds = array<i64: 3, 256>}, {pipeline_mode = #tpu.pipeline_mode<synchronous>, transform_indices = @transform_1, window_bounds = array<i64: 32, 3>}, {pipeline_mode = #tpu.pipeline_mode<synchronous>, transform_indices = @transform_2, window_bounds = array<i64: 32, 1>}, {pipeline_mode = #tpu.pipeline_mode<synchronous>, transform_indices = @transform_3, window_bounds = array<i64: 128, 32>}, {pipeline_mode = #tpu.pipeline_mode<synchronous>, transform_indices = @transform_4, window_bounds = array<i64: 128, 1>}, {pipeline_mode = #tpu.pipeline_mode<synchronous>, transform_indices = @transform_5, window_bounds = array<i64: 3, 32>}, {pipeline_mode = #tpu.pipeline_mode<synchronous>, transform_indices = @transform_6, window_bounds = array<i64: 3, 1>}, {transform_indices = @transform_7, window_bounds = array<i64: 3, 256>}, {transform_indices = @transform_8, window_bounds = array<i64: 1, 256>}, {transform_indices = @transform_9, window_bounds = array<i64: 1, 256>}]} {
    %c0 = arith.constant 0 : index
    %c0_0 = arith.constant 0 : index
    %0 = vector.load %arg1[%c0, %c0_0] : memref<3x256xf32, #tpu.memory_space<vmem>>, vector<3x256xf32>
    %c0_1 = arith.constant 0 : index
    %c0_2 = arith.constant 0 : index
    %1 = vector.load %arg2[%c0_1, %c0_2] : memref<32x3xf32, #tpu.memory_space<vmem>>, vector<32x3xf32>
    %cst = arith.constant dense<0.000000e+00> : vector<32x256xf32>
    %2 = tpu.matmul %1, %0, %cst {dimension_numbers = #tpu.dot_dimension_numbers<[1], [0], [0], [1], [0, 0, 1, 1], [], []>} : vector<32x3xf32>, vector<3x256xf32>, vector<32x256xf32> -> vector<32x256xf32>
    %c0_3 = arith.constant 0 : index
    %c0_4 = arith.constant 0 : index
    %3 = vector.load %arg3[%c0_3, %c0_4] : memref<32x1xf32, #tpu.memory_space<vmem>>, vector<32x1xf32>
    %4 = vector.broadcast %3 : vector<32x1xf32> to vector<32x256xf32>
    %5 = arith.addf %2, %4 : vector<32x256xf32>
    %6 = arith.mulf %5, %5 : vector<32x256xf32>
    %cst_5 = arith.constant dense<0.000000e+00> : vector<256xf32>
    %7 = vector.multi_reduction <add>, %6, %cst_5 [0] : vector<32x256xf32> to vector<256xf32>
    %8 = vector.shape_cast %7 : vector<256xf32> to vector<1x256xf32>
    %c0_6 = arith.constant 0 : index
    %c0_7 = arith.constant 0 : index
    %9 = vector.load %arg4[%c0_6, %c0_7] : memref<128x32xf32, #tpu.memory_space<vmem>>, vector<128x32xf32>
    %cst_8 = arith.constant dense<0.000000e+00> : vector<128x256xf32>
    %10 = tpu.matmul %9, %5, %cst_8 {dimension_numbers = #tpu.dot_dimension_numbers<[1], [0], [0], [1], [0, 0, 1, 1], [], []>} : vector<128x32xf32>, vector<32x256xf32>, vector<128x256xf32> -> vector<128x256xf32>
    %cst_9 = arith.constant 2.000000e+00 : f32
    %11 = vector.broadcast %cst_9 : f32 to vector<128x256xf32>
    %12 = arith.mulf %11, %10 : vector<128x256xf32>
    %13 = vector.broadcast %8 : vector<1x256xf32> to vector<128x256xf32>
    %14 = arith.subf %13, %12 : vector<128x256xf32>
    %c0_10 = arith.constant 0 : index
    %c0_11 = arith.constant 0 : index
    %15 = vector.load %arg5[%c0_10, %c0_11] : memref<128x1xf32, #tpu.memory_space<vmem>>, vector<128x1xf32>
    %16 = vector.broadcast %15 : vector<128x1xf32> to vector<128x256xf32>
    %17 = arith.addf %14, %16 : vector<128x256xf32>
    %cst_12 = arith.constant dense<0x7F800000> : vector<256xf32>
    %18 = vector.multi_reduction <minimumf>, %17, %cst_12 [0] : vector<128x256xf32> to vector<256xf32>
    %19 = vector.shape_cast %18 : vector<256xf32> to vector<1x256xf32>
    %20 = tpu.iota {dimensions = array<i32: 0>} : vector<128x256xi32>
    %21 = vector.broadcast %19 : vector<1x256xf32> to vector<128x256xf32>
    %22 = arith.cmpf oeq, %17, %21 : vector<128x256xf32>
    %c128_i32 = arith.constant 128 : i32
    %23 = vector.broadcast %c128_i32 : i32 to vector<128x256xi32>
    %24 = arith.select %22, %20, %23 : vector<128x256xi1>, vector<128x256xi32>
    %cst_13 = arith.constant dense<2147483647> : vector<256xi32>
    %25 = vector.multi_reduction <minsi>, %24, %cst_13 [0] : vector<128x256xi32> to vector<256xi32>
    %26 = vector.shape_cast %25 : vector<256xi32> to vector<1x256xi32>
    %c0_14 = arith.constant 0 : index
    %c0_15 = arith.constant 0 : index
    %27 = vector.load %arg9[%c0_14, %c0_15] : memref<1x256xi32, #tpu.memory_space<vmem>>, vector<1x256xi32>
    tpu.vector_store %arg9[%c0_14, %c0_15], %26 {strides = array<i32>} : memref<1x256xi32, #tpu.memory_space<vmem>>, vector<1x256xi32>,
    %28 = vector.broadcast %26 : vector<1x256xi32> to vector<128x256xi32>
    %29 = arith.cmpi eq, %20, %28 : vector<128x256xi32>
    %30 = arith.extui %29 : vector<128x256xi1> to vector<128x256xi32>
    %31 = arith.sitofp %30 : vector<128x256xi32> to vector<128x256xf32>
    %c0_16 = arith.constant 0 : index
    %c0_17 = arith.constant 0 : index
    %32 = vector.load %arg4[%c0_16, %c0_17] : memref<128x32xf32, #tpu.memory_space<vmem>>, vector<128x32xf32>
    %cst_18 = arith.constant dense<0.000000e+00> : vector<32x256xf32>
    %33 = tpu.matmul %32, %31, %cst_18 {dimension_numbers = #tpu.dot_dimension_numbers<[0], [0], [1], [1], [0, 1, 1, 1], [], []>} : vector<128x32xf32>, vector<128x256xf32>, vector<32x256xf32> -> vector<32x256xf32>
    %34 = tpu.iota {dimensions = array<i32: 1>} : vector<1x256xi32>
    %c256_i32 = arith.constant 256 : i32
    %35 = arith.muli %arg0, %c256_i32 : i32
    %36 = vector.broadcast %35 : i32 to vector<1x256xi32>
    %37 = arith.addi %36, %34 : vector<1x256xi32>
    %c512_i32 = arith.constant 512 : i32
    %38 = vector.broadcast %c512_i32 : i32 to vector<1x256xi32>
    %39 = arith.cmpi slt, %37, %38 : vector<1x256xi32>
    %cst_19 = arith.constant 0.000000e+00 : f32
    %40 = vector.broadcast %cst_19 : f32 to vector<1x256xf32>
    %41 = arith.maximumf %19, %40 : vector<1x256xf32>
    %cst_20 = arith.constant 0.000000e+00 : f32
    %42 = vector.broadcast %cst_20 : f32 to vector<1x256xf32>
    %43 = arith.select %39, %41, %42 : vector<1x256xi1>, vector<1x256xf32>
    %c0_21 = arith.constant 0 : index
    %c0_22 = arith.constant 0 : index
    %44 = vector.load %arg10[%c0_21, %c0_22] : memref<1x256xf32, #tpu.memory_space<vmem>>, vector<1x256xf32>
    tpu.vector_store %arg10[%c0_21, %c0_22], %43 {strides = array<i32>} : memref<1x256xf32, #tpu.memory_space<vmem>>, vector<1x256xf32>,
    %c0_23 = arith.constant 0 : index
    %c0_24 = arith.constant 0 : index
    %45 = vector.load %arg6[%c0_23, %c0_24] : memref<3x32xf32, #tpu.memory_space<vmem>>, vector<3x32xf32>
    %cst_25 = arith.constant dense<0.000000e+00> : vector<3x256xf32>
    %46 = tpu.matmul %45, %33, %cst_25 {dimension_numbers = #tpu.dot_dimension_numbers<[1], [0], [0], [1], [0, 0, 1, 1], [], []>} : vector<3x32xf32>, vector<32x256xf32>, vector<3x256xf32> -> vector<3x256xf32>
    %c0_26 = arith.constant 0 : index
    %c0_27 = arith.constant 0 : index
    %47 = vector.load %arg7[%c0_26, %c0_27] : memref<3x1xf32, #tpu.memory_space<vmem>>, vector<3x1xf32>
    %48 = vector.broadcast %47 : vector<3x1xf32> to vector<3x256xf32>
    %49 = arith.addf %46, %48 : vector<3x256xf32>
    %c0_28 = arith.constant 0 : index
    %c0_29 = arith.constant 0 : index
    %50 = vector.load %arg8[%c0_28, %c0_29] : memref<3x256xf32, #tpu.memory_space<vmem>>, vector<3x256xf32>
    tpu.vector_store %arg8[%c0_28, %c0_29], %49 {strides = array<i32>} : memref<3x256xf32, #tpu.memory_space<vmem>>, vector<3x256xf32>,
    return
  }
  func.func @transform_0(%arg0: i32) -> (i32, i32) {
    %c0_i32 = arith.constant 0 : i32
    %c0_i32_0 = arith.constant 0 : i32
    return %c0_i32, %arg0 : i32, i32
  }
  func.func @transform_1(%arg0: i32) -> (i32, i32) {
    %c0_i32 = arith.constant 0 : i32
    %c0_i32_0 = arith.constant 0 : i32
    %c0_i32_1 = arith.constant 0 : i32
    return %c0_i32, %c0_i32_0 : i32, i32
  }
  func.func @transform_2(%arg0: i32) -> (i32, i32) {
    %c0_i32 = arith.constant 0 : i32
    %c0_i32_0 = arith.constant 0 : i32
    %c0_i32_1 = arith.constant 0 : i32
    return %c0_i32, %c0_i32_0 : i32, i32
  }
  func.func @transform_3(%arg0: i32) -> (i32, i32) {
    %c0_i32 = arith.constant 0 : i32
    %c0_i32_0 = arith.constant 0 : i32
    %c0_i32_1 = arith.constant 0 : i32
    return %c0_i32, %c0_i32_0 : i32, i32
  }
  func.func @transform_4(%arg0: i32) -> (i32, i32) {
    %c0_i32 = arith.constant 0 : i32
    %c0_i32_0 = arith.constant 0 : i32
    %c0_i32_1 = arith.constant 0 : i32
    return %c0_i32, %c0_i32_0 : i32, i32
  }
  func.func @transform_5(%arg0: i32) -> (i32, i32) {
    %c0_i32 = arith.constant 0 : i32
    %c0_i32_0 = arith.constant 0 : i32
    %c0_i32_1 = arith.constant 0 : i32
    return %c0_i32, %c0_i32_0 : i32, i32
  }
  func.func @transform_6(%arg0: i32) -> (i32, i32) {
    %c0_i32 = arith.constant 0 : i32
    %c0_i32_0 = arith.constant 0 : i32
    %c0_i32_1 = arith.constant 0 : i32
    return %c0_i32, %c0_i32_0 : i32, i32
  }
  func.func @transform_7(%arg0: i32) -> (i32, i32) {
    %c0_i32 = arith.constant 0 : i32
    %c0_i32_0 = arith.constant 0 : i32
    return %c0_i32, %arg0 : i32, i32
  }
  func.func @transform_8(%arg0: i32) -> (i32, i32) {
    %c0_i32 = arith.constant 0 : i32
    %c0_i32_0 = arith.constant 0 : i32
    return %c0_i32, %arg0 : i32, i32
  }
  func.func @transform_9(%arg0: i32) -> (i32, i32) {
    %c0_i32 = arith.constant 0 : i32
    %c0_i32_0 = arith.constant 0 : i32
    return %c0_i32, %arg0 : i32, i32
  }
}

</mosaic_0001>

<bundles_post_ra>
// kernel: choose_forward.1
= control target key start
LH: loop header
LB: loop body
LE: loop exit
PB: predicated region body
PF: predicated region fallthrough
CT: control target
= control target key end

     0   :  { %s2632_s0 = inlined_call_operand.vmem [shape: f32[3,512], index: 0, kind: input, shape index: {}]   ;;  %s2633_s1 = inlined_call_operand.vmem [shape: f32[32,3], index: 1, kind: input, shape index: {}]   ;;  %s2634_s2 = inlined_call_operand.vmem [shape: f32[32,1], index: 2, kind: input, shape index: {}]   ;;  %s2635_s3 = inlined_call_operand.vmem [shape: f32[128,32], index: 3, kind: input, shape index: {}]   ;;  %s2636_s4 = inlined_call_operand.vmem [shape: f32[128,1], index: 4, kind: input, shape index: {}]   ;;  %s2637_s5 = inlined_call_operand.vmem [shape: f32[3,32], index: 5, kind: input, shape index: {}]   ;;  %s2638_s6 = inlined_call_operand.vmem [shape: f32[3,1], index: 6, kind: input, shape index: {}]   ;;  %s2639_s7 = inlined_call_operand.vmem [shape: f32[3,512], index: 7, kind: output, shape index: {0}]   ;;  %s2640_s8 = inlined_call_operand.hbm [shape: s32[1,512], index: 8, kind: output, shape index: {1}]   ;;  %s2641_s9 = inlined_call_operand.vmem [shape: f32[1,512], index: 9, kind: output, shape index: {2}]  }
   0x1   :  { %2644 = sst [smem:[#allocation5_spill]] %s2632_s0 }
   0x2   :  { %2645 = sst [smem:[#allocation6_spill]] %s2633_s1 }
   0x3   :  { %2646 = sst [smem:[#allocation7_spill]] %s2634_s2 }
   0x4   :  { %15 = vsyncpa [#allocation3], 0 }
   0x5   :  { %17 = vsyncpa [#allocation3 + $0x1], 0  ;;  %s1791_s30 = smov 0   ;;  %s1793_s10 = smov 0  }
   0x6   :  { %s1795_s11 = smov 0   ;;  %s1797_s12 = smov 0  }
   0x7 LB: > { %s1812_s13 = sadd.s32 4294967295, %s1737_s12   ;;  %s1505_s14 = sadd.s32 4294967294, %s1737_s12   ;;  %s1737_s12 = sphi %s1797_s12, %s2668_s12   ;;  %s1733_s11 = sphi %s1795_s11, %s2667_s11   ;;  %s1729_s10 = sphi %s1793_s10, %s2666_s10   ;;  %s1725_s30 = sphi %s1791_s30, %s2665_s30  }
   0x8   : > { %s1816_s15 = sadd.s32 1, %s1737_s12   ;;  %s208_s16 = sadd.s32 1, %s1733_s11 }
   0x9   : > { %s205_s17 = ssub.s32 %s1737_s12, %s1816_s15  ;;  %p218_p0 = scmp.ne.s32.totalorder %s1733_s11, %s1729_s10 }
   0xa   : > { %p206_p1 = scmp.eq.s32.totalorder %s205_s17, 0  ;;  %p219_p2 = scmp.eq.s32.totalorder %s1812_s13, 1 }
   0xb   : > { %p224_p3 = scmp.ne.s32.totalorder %s1729_s10, %s1725_s30  ;;  %p225_p4 = scmp.eq.s32.totalorder %s1505_s14, 1 }
   0xc   : > { %s1827_s18 = scalar_select %p206_p1, %s1733_s11, %s208_s16  }
   0xd   : > { %p1829_p5 = por %p219_p2, %p218_p0  ;;  %p1833_p6 = por %p225_p4, %p224_p3 }
   0xe   : > { %p1508_p7 = scmp.ge.s32.totalorder %s1737_s12, 1  ;;  %p296_p8 = scmp.lt.s32.totalorder %s1737_s12, 3 }
  0x10   : > { %p297_p9 = pnand %p1508_p7, %p296_p8 }
  0x11   : > { %s2649_s2 = sld [smem:[#allocation7_spill]] (!%p297_p9)  ;;  %s1846_s25 = sshll.u32 (!%p297_p9), %s1812_s13, 1 }
  0x12   : > { %300 = sbr.rel (%p297_p9) target bundleno = 842 (0x34a), region = 48  ;;  %p342_p10 = scmp.lt.s32.totalorder (!%p297_p9), %s1846_s25, 3 }
  0x13   : > { %s2650_s0 = sld [smem:[#allocation5_spill]] (!%p297_p9)  ;;  %s1621_s28 = sshll.u32 (!%p297_p9), %s1812_s13, 8 }
  0x14   : > { %s2651_s1 = sld [smem:[#allocation6_spill]] (!%p297_p9)  ;;  %s332_s17 = sand.u32 (!%p297_p9), 1, %s1729_s10  }
  0x15   : > { %s1392_s13 = scalar_lea.hbm (!%p297_p9), %s2640_s8, %s1846_s25  ;;  %s1374_s22 = scalar_lea.sflag (!%p297_p9), [#allocation3], %s332_s17 }
  0x17   : > { %v367_v0 = vld [vmem:[%s2649_s2 + $0x18] sm:$0xff]  ;;  %v365_v1 = vld [vmem:[%s2649_s2 + $0x8] sm:$0xff]  ;;  %v1739_v2 = vmov 0   ;;  %s1850_s26 = scalar_select %p342_p10, %s1846_s25, 3  ;;  %v366_v3 = vld [vmem:[%s2649_s2 + $0x10] sm:$0xff]  ;;  %vm405_vm0 = vcmask 1042432  }
  0x18   : > { %1673 = vset.pattern.permute.xlu1 %v1739_v2  ;;  %1672 = vset.pattern.permute.xlu0 %v1739_v2  ;;  %v364_v4 = vld [vmem:[%s2649_s2] sm:$0xff]  ;;  %vm392_vm1 = vcmask 23552   ;;  %v755_v7 = vld [vmem:[%s2636_s4 + $0x10] sm:$0xff]  ;;  %v756_v8 = vld [vmem:[%s2636_s4 + $0x18] sm:$0xff]  ;;  %vm2642_vm2 = vcmask 261120   ;;  %s1695_s2 = scalar_lea.hbm %s2640_s8, 4 }
  0x19   : > { %385 = vperm.xlu0 %1672, %v367_v0   ;;  %375 = vperm.xlu1 %1673, %v365_v1   ;;  %s2643_s27 = sshll.u32 %s1850_s26, 2  ;;  %v758_v12 = vld [vmem:[%s2636_s4 + $0x28] sm:$0xff]  ;;  %v759_v13 = vld [vmem:[%s2636_s4 + $0x30] sm:$0xff]  ;;  %v761_v15 = vld [vmem:[%s2636_s4 + $0x40] sm:$0xff]  ;;  %s357_s16 = scalar_lea.vmem %s2641_s9, %s1850_s26 }
  0x1a   : > { %1674 = vset.pattern.permute.xlu2 %v1739_v2  ;;  %s345_s14 = scalar_lea.vmem %s2650_s0, %s2643_s27  ;;  %v360_v6 = vld [vmem:[%s2651_s1] sm:$0xff]  ;;  %v361_v11 = vld [vmem:[%s2651_s1 + $0x8] sm:$0xff]  ;;  %v362_v14 = vld [vmem:[%s2651_s1 + $0x10] sm:$0xff] }
  0x1b   : > { %v359_v5 = vld [vmem:[%s345_s14] sm:$0x77]  ;;  %v762_v16 = vld [vmem:[%s2636_s4 + $0x48] sm:$0xff]  ;;  %v363_v17 = vld [vmem:[%s2651_s1 + $0x18] sm:$0xff]  ;;  %s2518_s14 = sshll.u32 %s332_s17, 1 }
  0x1c   : > { %389 = vst [vmem:[#allocation1] ss:$2 sm:$0xff] %v359_v5  ;;  %v764_v18 = vld [vmem:[%s2636_s4 + $0x58] sm:$0xff]  ;;  %v765_v19 = vld [vmem:[%s2636_s4 + $0x60] sm:$0xff]  ;;  %v767_v20 = vld [vmem:[%s2636_s4 + $0x70] sm:$0xff]  ;;  %s334_s21 = scalar_lea.vmem [#allocation2], %s2518_s14 }
  0x1d   : > { %v768_v21 = vld [vmem:[%s2636_s4 + $0x78] sm:$0xff]  ;;  %v1312_v22 = vld [vmem:[%s2638_s6] sm:$0x7]  ;;  %v495_v58 = vld [vmem:[%s2635_s3 + $0x8] sm:$0xff]  ;;  %s1394_s29 = sshll.u32 %s334_s21, 4  ;;  %s1395_s29 = int_to_ptr.vmem [resolvable:$true] %s1394_s29 }
  0x1e   : > { %v494_v57 = vld [vmem:[%s2635_s3] sm:$0xff]  ;;  %v496_v60 = vld [vmem:[%s2635_s3 + $0x10] sm:$0xff]  ;;  %v754_v61 = vld [vmem:[%s2636_s4 + $0x8] sm:$0xff] }
  0x1f   : > { %v753_v59 = vld [vmem:[%s2636_s4] sm:$0xff]  ;;  %v497_v62 = vld [vmem:[%s2635_s3 + $0x18] sm:$0xff]  ;;  %v1959_v0 = vld [vmem:[%s2635_s3 + $0x28] sm:$0xff] }
  0x20   : > { %771 = vperm.xlu2 %1674, %v753_v59   ;;  %v1950_v63 = vld [vmem:[%s2635_s3 + $0x20] sm:$0xff]  ;;  %v1971_v2 = vld [vmem:[%s2635_s3 + $0x30] sm:$0xff] }
  0x21   : > { %380 = vperm.xlu0 %1672, %v366_v3   ;;  %370 = vperm.xlu1 %1673, %v364_v4   ;;  %v757_v1 = vld [vmem:[%s2636_s4 + $0x20] sm:$0xff]  ;;  %v760_v3 = vld [vmem:[%s2636_s4 + $0x38] sm:$0xff]  ;;  %v763_v5 = vld [vmem:[%s2636_s4 + $0x50] sm:$0xff] }
  0x22   : > { %v1983_v4 = vld [vmem:[%s2635_s3 + $0x38] sm:$0xff] }
  0x23   : > { %v390_v9 = vld.sshfl [vmem:[#allocation1] sm:$0xff pattern:$0x75316420]  ;;  %v391_v10 = vld.sshfl [vmem:[#allocation1 + $0x8] sm:$0xff pattern:$0x75316420] }
  0x24   : > { %1515 = vmatpush.msk.msra.mxu0 %vm405_vm0, %v390_v9  ;;  %1520 = vmatpush.msk.msra.mxu1 %vm405_vm0, %v391_v10  ;;  %v2016_v9 = vld [vmem:[%s2635_s3 + $0x50] sm:$0xff]  ;;  %v2025_v10 = vld [vmem:[%s2635_s3 + $0x58] sm:$0xff] }
  0x25   : > { %1516 = vmatmul.msk.f32.vlgmr.msra.gmra.mxu0 %vm392_vm1, %v360_v6  ;;  %1521 = vmatmul.msk.f32.vlgmr.msra.gmra.mxu1 %vm392_vm1, %v360_v6  ;;  %v1995_v6 = vld [vmem:[%s2635_s3 + $0x40] sm:$0xff] }
  0x28   : > { %776 = vperm.xlu2 %1674, %v754_v61  }
  0x29   : > { %781 = vperm.xlu0 %1672, %v755_v7   ;;  %786 = vperm.xlu1 %1673, %v756_v8   ;;  %v766_v7 = vld [vmem:[%s2636_s4 + $0x68] sm:$0xff] }
  0x2a   : > { %v2007_v8 = vld [vmem:[%s2635_s3 + $0x48] sm:$0xff] }
  0x2d   : > { %1517 = vmatmul.msk.f32.gmra.mxu0 %vm392_vm1, %v361_v11  ;;  %1522 = vmatmul.msk.f32.gmra.mxu1 %vm392_vm1, %v361_v11  ;;  %v2034_v11 = vld [vmem:[%s2635_s3 + $0x60] sm:$0xff] }
  0x30   : > { %791 = vperm.xlu2 %1674, %v757_v1  }
  0x31   : > { %796 = vperm.xlu0 %1672, %v758_v12   ;;  %801 = vperm.xlu1 %1673, %v759_v13   ;;  %v2043_v12 = vld [vmem:[%s2635_s3 + $0x68] sm:$0xff]  ;;  %v2052_v13 = vld [vmem:[%s2635_s3 + $0x70] sm:$0xff] }
  0x35   : > { %1518 = vmatmul.msk.f32.gmra.mxu0 %vm392_vm1, %v362_v14  ;;  %1523 = vmatmul.msk.f32.gmra.mxu1 %vm392_vm1, %v362_v14 }
  0x38   : > { %806 = vperm.xlu2 %1674, %v760_v3  }
  0x39   : > { %811 = vperm.xlu0 %1672, %v761_v15   ;;  %816 = vperm.xlu1 %1673, %v762_v16  }
  0x3d   : > { %1519 = vmatmul.msk.f32.gmra.mxu0 %vm392_vm1, %v363_v17  ;;  %1524 = vmatmul.msk.f32.gmra.mxu1 %vm392_vm1, %v363_v17 }
  0x40   : > { %821 = vperm.xlu2 %1674, %v763_v5  }
  0x41   : > { %826 = vperm.xlu0 %1672, %v764_v18   ;;  %831 = vperm.xlu1 %1673, %v765_v19   ;;  %v2065_v18 = vld [vmem:[%s2635_s3 + $0x78] sm:$0xff] }
  0x48   : > { %836 = vperm.xlu2 %1674, %v766_v7  }
  0x49   : > { %841 = vperm.xlu0 %1672, %v767_v20   ;;  %846 = vperm.xlu1 %1673, %v768_v21  }
  0x51   : > { %1315 = vperm.xlu0 %1672, %v1312_v22  }
  0x6e   : > { %1202 = vxpose.xlu2.b32.start [1/16] (narrow) %v494_v57, 32 }
  0x76   : > { %1203 = vxpose.xlu2.b32.cont [2/16] (narrow) %v495_v58, 32 }
  0x7e   : > { %1204 = vxpose.xlu2.b32.cont [3/16] (narrow) %v496_v60, 32 }
  0x86   : > { %1205 = vxpose.xlu2.b32.cont [4/16] (narrow) %v497_v62, 32 }
  0x8b   : > { %v376_v23 = vpop.permute.xlu1 %375  ;;  %v386_v26 = vpop.permute.xlu0 %385 }
  0x8e   : > { %1206 = vxpose.xlu2.b32.cont [5/16] (narrow) %v1950_v63, 32 }
  0x93   : > { %v371_v27 = vpop.permute.xlu1 %370  ;;  %v381_v40 = vpop.permute.xlu0 %380 }
  0x96   : > { %1207 = vxpose.xlu2.b32.cont [6/16] (narrow) %v1959_v0, 32 }
  0x9e   : > { %1208 = vxpose.xlu2.b32.cont [7/16] (narrow) %v1971_v2, 32 }
  0xa2   : > { %v427_v24 = vpop.f32.mrf.mxu0  ;;  %v456_v25 = vpop.f32.mrf.mxu1 }
  0xa3   : > { %v428_v28 = vadd.f32 %v427_v24, %v371_v27  ;;  %v457_v29 = vadd.f32 %v456_v25, %v371_v27 }
  0xa5   : > { %v468_v34 = vmul.f32 %v428_v28, %v428_v28  ;;  %v469_v35 = vmul.f32 %v457_v29, %v457_v29 }
  0xa6   : > { %1209 = vxpose.xlu2.b32.cont [8/16] (narrow) %v1983_v4, 32 }
  0xaa   : > { %v430_v30 = vpop.f32.mrf.mxu0  ;;  %v459_v31 = vpop.f32.mrf.mxu1 }
  0xab   : > { %v431_v32 = vadd.f32 %v430_v30, %v376_v23  ;;  %v460_v33 = vadd.f32 %v459_v31, %v376_v23 }
  0xad   : > { %v470_v36 = vmul.f32 %v431_v32, %v431_v32  ;;  %v471_v37 = vmul.f32 %v460_v33, %v460_v33 }
  0xae   : > { %1210 = vxpose.xlu2.b32.cont [9/16] (narrow) %v1995_v6, 32 }
  0xaf   : > { %v476_v38 = vadd.f32 %v470_v36, %v468_v34  ;;  %v485_v39 = vadd.f32 %v471_v37, %v469_v35 }
  0xb2   : > { %v433_v41 = vpop.f32.mrf.mxu0  ;;  %v462_v42 = vpop.f32.mrf.mxu1 }
  0xb3   : > { %v434_v43 = vadd.f32 %v433_v41, %v381_v40  ;;  %v463_v44 = vadd.f32 %v462_v42, %v381_v40 }
  0xb5   : > { %v472_v45 = vmul.f32 %v434_v43, %v434_v43  ;;  %v473_v46 = vmul.f32 %v463_v44, %v463_v44 }
  0xb6   : > { %1211 = vxpose.xlu2.b32.cont [10/16] (narrow) %v2007_v8, 32 }
  0xb7   : > { %v477_v47 = vadd.f32 %v476_v38, %v472_v45  ;;  %v486_v48 = vadd.f32 %v485_v39, %v473_v46  ;;  %v772_v39 = vpop.permute.xlu2 %771  ;;  %v782_v46 = vpop.permute.xlu0 %781 }
  0xba   : > { %v436_v49 = vpop.f32.mrf.mxu0  ;;  %v465_v50 = vpop.f32.mrf.mxu1 }
  0xbb   : > { %v437_v51 = vadd.f32 %v436_v49, %v386_v26  ;;  %v466_v52 = vadd.f32 %v465_v50, %v386_v26 }
  0xbd   : > { %v474_v53 = vmul.f32 %v437_v51, %v437_v51  ;;  %v475_v54 = vmul.f32 %v466_v52, %v466_v52  ;;  %571 = vmatpush.msra.mxu2 %v437_v51  ;;  %636 = vmatpush.msra.mxu3 %v466_v52 }
  0xbe   : > { %1212 = vxpose.xlu2.b32.cont [11/16] (narrow) %v2016_v9, 32 }
  0xbf   : > { %v1917_v55 = vadd.f32 %v477_v47, %v474_v53  ;;  %v1919_v56 = vadd.f32 %v486_v48, %v475_v54  ;;  %572 = vmatpush.msra.mxu2 %v434_v43  ;;  %637 = vmatpush.msra.mxu3 %v463_v44 }
  0xc1   : > { %573 = vmatpush.msra.mxu2 %v431_v32  ;;  %638 = vmatpush.msra.mxu3 %v460_v33  ;;  %v479_v14 = vrot.slane %v1917_v55, 4  ;;  %v488_v15 = vrot.slane %v1919_v56, 4 }
  0xc3   : > { %574 = vmatpush.msra.mxu2 %v428_v28  ;;  %639 = vmatpush.msra.mxu3 %v457_v29  ;;  %v480_v16 = vadd.f32 %v479_v14, %v1917_v55  ;;  %v489_v17 = vadd.f32 %v488_v15, %v1919_v56 }
  0xc4   : > { %1525 = vmatmul.msk.f32.vlgmr.msra.gmra.mxu2 %vm2642_vm2, %v494_v57  ;;  %1541 = vmatmul.msk.f32.vlgmr.msra.gmra.mxu3 %vm2642_vm2, %v494_v57  ;;  %v777_v57 = vpop.permute.xlu2 %776 }
  0xc5   : > { %v481_v19 = vrot.slane %v480_v16, 2  ;;  %v490_v20 = vrot.slane %v489_v17, 2 }
  0xc6   : > { %1213 = vxpose.xlu2.b32.cont [12/16] (narrow) %v2025_v10, 32 }
  0xc7   : > { %v482_v21 = vadd.f32 %v481_v19, %v480_v16  ;;  %v491_v22 = vadd.f32 %v490_v20, %v489_v17 }
  0xc9   : > { %v483_v23 = vrot.slane %v482_v21, 1  ;;  %v492_v24 = vrot.slane %v491_v22, 1 }
  0xcb   : > { %v2071_v27 = vadd.f32 %v483_v23, %v482_v21  ;;  %v2073_v28 = vadd.f32 %v492_v24, %v491_v22 }
  0xcc   : > { %1526 = vmatmul.msk.f32.gmra.mxu2 %vm2642_vm2, %v495_v58  ;;  %1542 = vmatmul.msk.f32.gmra.mxu3 %vm2642_vm2, %v495_v58  ;;  %v792_v15 = vpop.permute.xlu2 %791 }
  0xce   : > { %1214 = vxpose.xlu2.b32.cont [13/16] (narrow) %v2034_v11, 32 }
  0xd4   : > { %1527 = vmatmul.msk.f32.gmra.mxu2 %vm2642_vm2, %v496_v60  ;;  %1543 = vmatmul.msk.f32.gmra.mxu3 %vm2642_vm2, %v496_v60  ;;  %v787_v60 = vpop.permute.xlu1 %786 }
  0xd6   : > { %1215 = vxpose.xlu2.b32.cont [14/16] (narrow) %v2043_v12, 32 }
  0xdc   : > { %1528 = vmatmul.msk.f32.gmra.mxu2 %vm2642_vm2, %v497_v62  ;;  %1544 = vmatmul.msk.f32.gmra.mxu3 %vm2642_vm2, %v497_v62 }
  0xde   : > { %1216 = vxpose.xlu2.b32.cont [15/16] (narrow) %v2052_v13, 32 }
  0xe4   : > { %1529 = vmatmul.msk.f32.gmra.mxu2 %vm2642_vm2, %v1950_v63  ;;  %1545 = vmatmul.msk.f32.gmra.mxu3 %vm2642_vm2, %v1950_v63 }
  0xe6   : > { %1217 = vxpose.xlu2.b32.end [16/16] (narrow) %v2065_v18, 32 }
  0xec   : > { %1530 = vmatmul.msk.f32.gmra.mxu2 %vm2642_vm2, %v1959_v0  ;;  %1546 = vmatmul.msk.f32.gmra.mxu3 %vm2642_vm2, %v1959_v0 }
  0xf4   : > { %1531 = vmatmul.msk.f32.gmra.mxu2 %vm2642_vm2, %v1971_v2  ;;  %1547 = vmatmul.msk.f32.gmra.mxu3 %vm2642_vm2, %v1971_v2 }
  0xfc   : > { %1532 = vmatmul.msk.f32.gmra.mxu2 %vm2642_vm2, %v1983_v4  ;;  %1548 = vmatmul.msk.f32.gmra.mxu3 %vm2642_vm2, %v1983_v4 }
 0x104   : > { %1533 = vmatmul.msk.f32.gmra.mxu2 %vm2642_vm2, %v1995_v6  ;;  %1549 = vmatmul.msk.f32.gmra.mxu3 %vm2642_vm2, %v1995_v6 }
 0x10c   : > { %1534 = vmatmul.msk.f32.gmra.mxu2 %vm2642_vm2, %v2007_v8  ;;  %1550 = vmatmul.msk.f32.gmra.mxu3 %vm2642_vm2, %v2007_v8 }
 0x114   : > { %1535 = vmatmul.msk.f32.gmra.mxu2 %vm2642_vm2, %v2016_v9  ;;  %1551 = vmatmul.msk.f32.gmra.mxu3 %vm2642_vm2, %v2016_v9 }
 0x11c   : > { %1536 = vmatmul.msk.f32.gmra.mxu2 %vm2642_vm2, %v2025_v10  ;;  %1552 = vmatmul.msk.f32.gmra.mxu3 %vm2642_vm2, %v2025_v10 }
 0x124   : > { %1537 = vmatmul.msk.f32.gmra.mxu2 %vm2642_vm2, %v2034_v11  ;;  %1553 = vmatmul.msk.f32.gmra.mxu3 %vm2642_vm2, %v2034_v11 }
 0x12c   : > { %1538 = vmatmul.msk.f32.gmra.mxu2 %vm2642_vm2, %v2043_v12  ;;  %1554 = vmatmul.msk.f32.gmra.mxu3 %vm2642_vm2, %v2043_v12 }
 0x134   : > { %1539 = vmatmul.msk.f32.gmra.mxu2 %vm2642_vm2, %v2052_v13  ;;  %1555 = vmatmul.msk.f32.gmra.mxu3 %vm2642_vm2, %v2052_v13 }
 0x13c   : > { %1540 = vmatmul.msk.f32.gmra.mxu2 %vm2642_vm2, %v2065_v18  ;;  %1556 = vmatmul.msk.f32.gmra.mxu3 %vm2642_vm2, %v2065_v18 }
 0x147   : > { %v576_v25 = vpop.f32.mrf.mxu2  ;;  %v641_v26 = vpop.f32.mrf.mxu3 }
 0x148   : > { %v689_v29 = vmul.f32 2.0, %v576_v25  ;;  %v690_v30 = vmul.f32 2.0, %v641_v26 }
 0x14a   : > { %v721_v31 = vsub.f32 %v2071_v27, %v689_v29  ;;  %v722_v32 = vsub.f32 %v2073_v28, %v690_v30  ;;  %v797_v30 = vpop.permute.xlu0 %796 }
 0x14c   : > { %v2084_v47 = vadd.f32 %v772_v39, %v721_v31  ;;  %v2086_v48 = vadd.f32 %v772_v39, %v722_v32 }
 0x14f   : > { %v579_v33 = vpop.f32.mrf.mxu2  ;;  %v644_v34 = vpop.f32.mrf.mxu3 }
 0x150   : > { %v691_v35 = vmul.f32 2.0, %v579_v33  ;;  %v692_v36 = vmul.f32 2.0, %v644_v34 }
 0x152   : > { %v723_v37 = vsub.f32 %v2071_v27, %v691_v35  ;;  %v724_v38 = vsub.f32 %v2073_v28, %v692_v36 }
 0x154   : > { %v2099_v61 = vadd.f32 %v777_v57, %v723_v37  ;;  %v2101_v62 = vadd.f32 %v777_v57, %v724_v38 }
 0x157   : > { %v582_v40 = vpop.f32.mrf.mxu2  ;;  %v647_v41 = vpop.f32.mrf.mxu3 }
 0x158   : > { %v693_v42 = vmul.f32 2.0, %v582_v40  ;;  %v694_v43 = vmul.f32 2.0, %v647_v41  ;;  %v802_v40 = vpop.permute.xlu1 %801 }
 0x15a   : > { %v725_v44 = vsub.f32 %v2071_v27, %v693_v42  ;;  %v726_v45 = vsub.f32 %v2073_v28, %v694_v43 }
 0x15c   : > { %v2088_v49 = vadd.f32 %v782_v46, %v725_v44  ;;  %v2090_v50 = vadd.f32 %v782_v46, %v726_v45 }
 0x15e   : > { %v881_v51 = vmin.f32 %v2084_v47, %v2088_v49  ;;  %v902_v52 = vmin.f32 %v2086_v48, %v2090_v50 }
 0x15f   : > { %v585_v53 = vpop.f32.mrf.mxu2  ;;  %v650_v54 = vpop.f32.mrf.mxu3 }
 0x160   : > { %v695_v55 = vmul.f32 2.0, %v585_v53  ;;  %v696_v56 = vmul.f32 2.0, %v650_v54  ;;  %v807_v54 = vpop.permute.xlu2 %806 }
 0x162   : > { %v727_v58 = vsub.f32 %v2071_v27, %v695_v55  ;;  %v728_v59 = vsub.f32 %v2073_v28, %v696_v56 }
 0x164   : > { %v2103_v63 = vadd.f32 %v787_v60, %v727_v58  ;;  %v2105_v0 = vadd.f32 %v787_v60, %v728_v59 }
 0x166   : > { %v882_v1 = vmin.f32 %v2099_v61, %v2103_v63  ;;  %v903_v2 = vmin.f32 %v2101_v62, %v2105_v0 }
 0x167   : > { %v588_v3 = vpop.f32.mrf.mxu2  ;;  %v653_v5 = vpop.f32.mrf.mxu3 }
 0x168   : > { %v697_v7 = vmul.f32 2.0, %v588_v3  ;;  %v698_v14 = vmul.f32 2.0, %v653_v5  ;;  %v812_v5 = vpop.permute.xlu0 %811 }
 0x16a   : > { %v729_v4 = vsub.f32 %v2071_v27, %v697_v7  ;;  %v730_v16 = vsub.f32 %v2073_v28, %v698_v14 }
 0x16c   : > { %v2114_v17 = vadd.f32 %v792_v15, %v729_v4  ;;  %v2116_v19 = vadd.f32 %v792_v15, %v730_v16 }
 0x16e   : > { %v883_v20 = vmin.f32 %v881_v51, %v2114_v17  ;;  %v904_v21 = vmin.f32 %v902_v52, %v2116_v19 }
 0x16f   : > { %v591_v22 = vpop.f32.mrf.mxu2  ;;  %v656_v23 = vpop.f32.mrf.mxu3 }
 0x170   : > { %v699_v24 = vmul.f32 2.0, %v591_v22  ;;  %v700_v25 = vmul.f32 2.0, %v656_v23 }
 0x172   : > { %v731_v26 = vsub.f32 %v2071_v27, %v699_v24  ;;  %v732_v29 = vsub.f32 %v2073_v28, %v700_v25  ;;  %v817_v24 = vpop.permute.xlu1 %816 }
 0x174   : > { %v2123_v6 = vadd.f32 %v797_v30, %v731_v26  ;;  %v2125_v31 = vadd.f32 %v797_v30, %v732_v29 }
 0x176   : > { %v884_v32 = vmin.f32 %v882_v1, %v2123_v6  ;;  %v905_v33 = vmin.f32 %v903_v2, %v2125_v31 }
 0x177   : > { %v594_v34 = vpop.f32.mrf.mxu2  ;;  %v659_v35 = vpop.f32.mrf.mxu3 }
 0x178   : > { %v701_v36 = vmul.f32 2.0, %v594_v34  ;;  %v702_v37 = vmul.f32 2.0, %v659_v35 }
 0x17a   : > { %v733_v38 = vsub.f32 %v2071_v27, %v701_v36  ;;  %v734_v39 = vsub.f32 %v2073_v28, %v702_v37  ;;  %v822_v37 = vpop.permute.xlu2 %821 }
 0x17c   : > { %v2132_v8 = vadd.f32 %v802_v40, %v733_v38  ;;  %v2134_v41 = vadd.f32 %v802_v40, %v734_v39 }
 0x17e   : > { %v885_v42 = vmin.f32 %v883_v20, %v2132_v8  ;;  %v906_v43 = vmin.f32 %v904_v21, %v2134_v41 }
 0x17f   : > { %v597_v44 = vpop.f32.mrf.mxu2  ;;  %v662_v45 = vpop.f32.mrf.mxu3 }
 0x180   : > { %v703_v46 = vmul.f32 2.0, %v597_v44  ;;  %v704_v51 = vmul.f32 2.0, %v662_v45 }
 0x182   : > { %v735_v52 = vsub.f32 %v2071_v27, %v703_v46  ;;  %v736_v53 = vsub.f32 %v2073_v28, %v704_v51 }
 0x184   : > { %v2141_v9 = vadd.f32 %v807_v54, %v735_v52  ;;  %v2143_v55 = vadd.f32 %v807_v54, %v736_v53  ;;  %v827_v52 = vpop.permute.xlu0 %826 }
 0x186   : > { %v886_v56 = vmin.f32 %v884_v32, %v2141_v9  ;;  %v907_v57 = vmin.f32 %v905_v33, %v2143_v55 }
 0x187   : > { %v600_v58 = vpop.f32.mrf.mxu2  ;;  %v665_v59 = vpop.f32.mrf.mxu3 }
 0x188   : > { %v705_v60 = vmul.f32 2.0, %v600_v58  ;;  %v706_v1 = vmul.f32 2.0, %v665_v59 }
 0x18a   : > { %v737_v2 = vsub.f32 %v2071_v27, %v705_v60  ;;  %v738_v3 = vsub.f32 %v2073_v28, %v706_v1 }
 0x18c   : > { %v2150_v10 = vadd.f32 %v812_v5, %v737_v2  ;;  %v2152_v7 = vadd.f32 %v812_v5, %v738_v3  ;;  %v832_v3 = vpop.permute.xlu1 %831 }
 0x18e   : > { %v887_v14 = vmin.f32 %v885_v42, %v2150_v10  ;;  %v908_v15 = vmin.f32 %v906_v43, %v2152_v7 }
 0x18f   : > { %v603_v4 = vpop.f32.mrf.mxu2  ;;  %v668_v16 = vpop.f32.mrf.mxu3 }
 0x190   : > { %v707_v20 = vmul.f32 2.0, %v603_v4  ;;  %v708_v21 = vmul.f32 2.0, %v668_v16 }
 0x192   : > { %v739_v22 = vsub.f32 %v2071_v27, %v707_v20  ;;  %v740_v23 = vsub.f32 %v2073_v28, %v708_v21 }
 0x194   : > { %v2159_v11 = vadd.f32 %v817_v24, %v739_v22  ;;  %v2161_v25 = vadd.f32 %v817_v24, %v740_v23  ;;  %v837_v24 = vpop.permute.xlu2 %836 }
 0x196   : > { %v888_v26 = vmin.f32 %v886_v56, %v2159_v11  ;;  %v909_v29 = vmin.f32 %v907_v57, %v2161_v25 }
 0x197   : > { %v606_v30 = vpop.f32.mrf.mxu2  ;;  %v671_v32 = vpop.f32.mrf.mxu3 }
 0x198   : > { %v709_v33 = vmul.f32 2.0, %v606_v30  ;;  %v710_v34 = vmul.f32 2.0, %v671_v32 }
 0x19a   : > { %v741_v35 = vsub.f32 %v2071_v27, %v709_v33  ;;  %v742_v36 = vsub.f32 %v2073_v28, %v710_v34 }
 0x19c   : > { %v2168_v12 = vadd.f32 %v822_v37, %v741_v35  ;;  %v2170_v38 = vadd.f32 %v822_v37, %v742_v36 }
 0x19e   : > { %v889_v39 = vmin.f32 %v887_v14, %v2168_v12  ;;  %v910_v40 = vmin.f32 %v908_v15, %v2170_v38 }
 0x19f   : > { %v609_v42 = vpop.f32.mrf.mxu2  ;;  %v674_v43 = vpop.f32.mrf.mxu3 }
 0x1a0   : > { %v711_v44 = vmul.f32 2.0, %v609_v42  ;;  %v712_v45 = vmul.f32 2.0, %v674_v43 }
 0x1a2   : > { %v743_v46 = vsub.f32 %v2071_v27, %v711_v44  ;;  %v744_v51 = vsub.f32 %v2073_v28, %v712_v45 }
 0x1a4   : > { %v2177_v13 = vadd.f32 %v827_v52, %v743_v46  ;;  %v2179_v53 = vadd.f32 %v827_v52, %v744_v51 }
 0x1a6   : > { %v890_v54 = vmin.f32 %v888_v26, %v2177_v13  ;;  %v911_v56 = vmin.f32 %v909_v29, %v2179_v53 }
 0x1a7   : > { %v612_v57 = vpop.f32.mrf.mxu2  ;;  %v677_v58 = vpop.f32.mrf.mxu3 }
 0x1a8   : > { %v713_v59 = vmul.f32 2.0, %v612_v57  ;;  %v714_v60 = vmul.f32 2.0, %v677_v58  ;;  %v847_v58 = vpop.permute.xlu1 %846 }
 0x1aa   : > { %v745_v1 = vsub.f32 %v2071_v27, %v713_v59  ;;  %v746_v2 = vsub.f32 %v2073_v28, %v714_v60 }
 0x1ac   : > { %v2185_v5 = vadd.f32 %v832_v3, %v745_v1  ;;  %v2187_v18 = vadd.f32 %v832_v3, %v746_v2 }
 0x1ae   : > { %v891_v14 = vmin.f32 %v889_v39, %v2185_v5  ;;  %v912_v15 = vmin.f32 %v910_v40, %v2187_v18  ;;  %v842_v40 = vpop.permute.xlu0 %841 }
 0x1af   : > { %v615_v4 = vpop.f32.mrf.mxu2  ;;  %v680_v16 = vpop.f32.mrf.mxu3 }
 0x1b0   : > { %v715_v20 = vmul.f32 2.0, %v615_v4  ;;  %v716_v21 = vmul.f32 2.0, %v680_v16  ;;  %v923_v4 = vlaneseq }
 0x1b2   : > { %v747_v22 = vsub.f32 %v2071_v27, %v715_v20  ;;  %v748_v23 = vsub.f32 %v2073_v28, %v716_v21 }
 0x1b4   : > { %v2193_v26 = vadd.f32 %v837_v24, %v747_v22  ;;  %v2195_v29 = vadd.f32 %v837_v24, %v748_v23 }
 0x1b6   : > { %v892_v30 = vmin.f32 %v890_v54, %v2193_v26  ;;  %v913_v32 = vmin.f32 %v911_v56, %v2195_v29 }
 0x1b7   : > { %v618_v33 = vpop.f32.mrf.mxu2  ;;  %v683_v34 = vpop.f32.mrf.mxu3 }
 0x1b8   : > { %v717_v35 = vmul.f32 2.0, %v618_v33  ;;  %v718_v36 = vmul.f32 2.0, %v683_v34  ;;  %v1293_v34 = vand.u32 127, %v923_v4 }
 0x1ba   : > { %v749_v37 = vsub.f32 %v2071_v27, %v717_v35  ;;  %v750_v39 = vsub.f32 %v2073_v28, %v718_v36 }
 0x1bc   : > { %v2201_v42 = vadd.f32 %v842_v40, %v749_v37  ;;  %v2203_v43 = vadd.f32 %v842_v40, %v750_v39 }
 0x1be   : > { %v893_v44 = vmin.f32 %v891_v14, %v2201_v42  ;;  %v914_v45 = vmin.f32 %v912_v15, %v2203_v43 }
 0x1bf   : > { %v621_v46 = vpop.f32.mrf.mxu2  ;;  %v686_v51 = vpop.f32.mrf.mxu3 }
 0x1c0   : > { %v719_v52 = vmul.f32 2.0, %v621_v46  ;;  %v720_v54 = vmul.f32 2.0, %v686_v51 }
 0x1c2   : > { %v751_v56 = vsub.f32 %v2071_v27, %v719_v52  ;;  %v752_v57 = vsub.f32 %v2073_v28, %v720_v54  ;;  %v2216_v27 = vshrl.u32 %v923_v4, 7 }
 0x1c4   : > { %v2209_v59 = vadd.f32 %v847_v58, %v751_v56  ;;  %v2211_v60 = vadd.f32 %v847_v58, %v752_v57  ;;  %v2219_v24 = vadd.s32 8, %v2216_v27  ;;  %v2229_v36 = vadd.s32 32, %v2216_v27 }
 0x1c5   : > { %v2232_v37 = vadd.s32 40, %v2216_v27  ;;  %v2235_v39 = vadd.s32 48, %v2216_v27  ;;  %v2239_v40 = vadd.s32 56, %v2216_v27  ;;  %v2248_v46 = vadd.s32 80, %v2216_v27 }
 0x1c6   : > { %v894_v1 = vmin.f32 %v892_v30, %v2209_v59  ;;  %v915_v2 = vmin.f32 %v913_v32, %v2211_v60  ;;  %v2222_v30 = vadd.s32 16, %v2216_v27  ;;  %v2225_v32 = vadd.s32 24, %v2216_v27 }
 0x1c7   : > { %v2253_v52 = vadd.s32 88, %v2216_v27  ;;  %v2256_v54 = vadd.s32 96, %v2216_v27  ;;  %v2259_v56 = vadd.s32 104, %v2216_v27  ;;  %v2262_v57 = vadd.s32 112, %v2216_v27 }
 0x1c8   : > { %v895_v3 = vmin.f32 %v893_v44, %v894_v1  ;;  %v916_v14 = vmin.f32 %v914_v45, %v915_v2  ;;  %v2242_v44 = vadd.s32 64, %v2216_v27  ;;  %v2245_v45 = vadd.s32 72, %v2216_v27 }
 0x1c9   : > { %v1294_v1 = vadd.s32 128, %v1293_v34  ;;  %v1296_v2 = vstv %s1621_s28 }
 0x1ca   : > { %v896_v15 = vrot.slane %v895_v3, 4  ;;  %v917_v16 = vrot.slane %v916_v14, 4 }
 0x1cc   : > { %v897_v20 = vmin.f32 %v895_v3, %v896_v15  ;;  %v918_v28 = vmin.f32 %v916_v14, %v917_v16  ;;  %v2297_v3 = vadd.s32 120, %v2216_v27  ;;  %v2301_v15 = vadd.s32 %v1296_v2, %v1293_v34 }
 0x1cd   : > { %v2303_v16 = vadd.s32 %v1296_v2, %v1294_v1 }
 0x1ce   : > { %v898_v21 = vrot.slane %v897_v20, 2  ;;  %v919_v22 = vrot.slane %v918_v28, 2 }
 0x1d0   : > { %v899_v23 = vmin.f32 %v897_v20, %v898_v21  ;;  %v920_v33 = vmin.f32 %v918_v28, %v919_v22 }
 0x1d2   : > { %v900_v35 = vrot.slane %v899_v23, 1  ;;  %v921_v58 = vrot.slane %v920_v33, 1 }
 0x1d4   : > { %v2250_v51 = vmin.f32 %v899_v23, %v900_v35  ;;  %v2299_v14 = vmin.f32 %v920_v33, %v921_v58 }
 0x1d6   : > { %vm940_vm3 = vcmp.eq.f32.partialorder %v2084_v47, %v2250_v51  ;;  %vm942_vm4 = vcmp.eq.f32.partialorder %v2099_v61, %v2250_v51  ;;  %vm944_vm5 = vcmp.eq.f32.partialorder %v2088_v49, %v2250_v51  ;;  %vm946_vm6 = vcmp.eq.f32.partialorder %v2103_v63, %v2250_v51 }
 0x1d7   : > { %vm948_vm7 = vcmp.eq.f32.partialorder %v2114_v17, %v2250_v51  ;;  %vm950_vm8 = vcmp.eq.f32.partialorder %v2123_v6, %v2250_v51  ;;  %vm952_vm9 = vcmp.eq.f32.partialorder %v2132_v8, %v2250_v51  ;;  %vm954_vm10 = vcmp.eq.f32.partialorder %v2141_v9, %v2250_v51 }
 0x1d8   : > { %vm956_vm11 = vcmp.eq.f32.partialorder %v2150_v10, %v2250_v51  ;;  %vm958_vm12 = vcmp.eq.f32.partialorder %v2159_v11, %v2250_v51  ;;  %vm960_vm13 = vcmp.eq.f32.partialorder %v2168_v12, %v2250_v51  ;;  %vm962_vm14 = vcmp.eq.f32.partialorder %v2177_v13, %v2250_v51 }
 0x1d9   : > { %vm964_vm15 = vcmp.eq.f32.partialorder %v2185_v5, %v2250_v51  ;;  %vm966_vm0 = vcmp.eq.f32.partialorder %v2193_v26, %v2250_v51  ;;  %vm968_vm1 = vcmp.eq.f32.partialorder %v2201_v42, %v2250_v51  ;;  %vm970_vm2 = vcmp.eq.f32.partialorder %v2209_v59, %v2250_v51 }
 0x1da   : > { %v972_v20 = vsel %vm940_vm3, %v2216_v27, 128  ;;  %v974_v28 = vsel %vm942_vm4, %v2219_v24, 128  ;;  %v976_v21 = vsel %vm944_vm5, %v2222_v30, 128  ;;  %v978_v22 = vsel %vm946_vm6, %v2225_v32, 128 }
 0x1db   : > { %v980_v47 = vsel %vm948_vm7, %v2229_v36, 128  ;;  %v982_v61 = vsel %vm950_vm8, %v2232_v37, 128  ;;  %v984_v49 = vsel %vm952_vm9, %v2235_v39, 128  ;;  %v986_v63 = vsel %vm954_vm10, %v2239_v40, 128 }
 0x1dc   : > { %v988_v17 = vsel %vm956_vm11, %v2242_v44, 128  ;;  %v990_v6 = vsel %vm958_vm12, %v2245_v45, 128  ;;  %v992_v8 = vsel %vm960_vm13, %v2248_v46, 128  ;;  %v994_v9 = vsel %vm962_vm14, %v2253_v52, 128 }
 0x1dd   : > { %vm1004_vm3 = vcmp.lt.s32.totalorder %v972_v20, %v976_v21  ;;  %vm1006_vm4 = vcmp.lt.s32.totalorder %v974_v28, %v978_v22  ;;  %vm941_vm5 = vcmp.eq.f32.partialorder %v2086_v48, %v2299_v14  ;;  %vm943_vm6 = vcmp.eq.f32.partialorder %v2101_v62, %v2299_v14 }
 0x1de   : > { %v1005_v10 = vsel %vm1004_vm3, %v972_v20, %v976_v21  ;;  %v1007_v11 = vsel %vm1006_vm4, %v974_v28, %v978_v22  ;;  %vm957_vm8 = vcmp.eq.f32.partialorder %v2152_v7, %v2299_v14  ;;  %vm965_vm14 = vcmp.eq.f32.partialorder %v2187_v18, %v2299_v14 }
 0x1df   : > { %vm1008_vm9 = vcmp.lt.s32.totalorder %v1005_v10, %v980_v47  ;;  %vm1010_vm10 = vcmp.lt.s32.totalorder %v1007_v11, %v982_v61  ;;  %vm967_vm11 = vcmp.eq.f32.partialorder %v2195_v29, %v2299_v14  ;;  %v996_v58 = vsel %vm964_vm15, %v2256_v54, 128 }
 0x1e0   : > { %v1009_v12 = vsel %vm1008_vm9, %v1005_v10, %v980_v47  ;;  %v1011_v13 = vsel %vm1010_vm10, %v1007_v11, %v982_v61  ;;  %vm963_vm10 = vcmp.eq.f32.partialorder %v2179_v53, %v2299_v14  ;;  %v998_v1 = vsel %vm966_vm0, %v2259_v56, 128 }
 0x1e1   : > { %vm1012_vm3 = vcmp.lt.s32.totalorder %v1009_v12, %v984_v49  ;;  %vm1014_vm4 = vcmp.lt.s32.totalorder %v1011_v13, %v986_v63  ;;  %v1000_v28 = vsel %vm968_vm1, %v2262_v57, 128  ;;  %v1002_v5 = vsel %vm970_vm2, %v2297_v3, 128 }
 0x1e2   : > { %v1013_v23 = vsel %vm1012_vm3, %v1009_v12, %v984_v49  ;;  %v1015_v33 = vsel %vm1014_vm4, %v1011_v13, %v986_v63  ;;  %vm969_vm3 = vcmp.eq.f32.partialorder %v2203_v43, %v2299_v14  ;;  %vm971_vm4 = vcmp.eq.f32.partialorder %v2211_v60, %v2299_v14 }
 0x1e3   : > { %vm1016_vm13 = vcmp.lt.s32.totalorder %v1013_v23, %v988_v17  ;;  %vm1018_vm12 = vcmp.lt.s32.totalorder %v1015_v33, %v990_v6  ;;  %v973_v26 = vsel %vm941_vm5, %v2216_v27, 128  ;;  %v975_v42 = vsel %vm943_vm6, %v2219_v24, 128 }
 0x1e4   : > { %v1017_v34 = vsel %vm1016_vm13, %v1013_v23, %v988_v17  ;;  %v1019_v35 = vsel %vm1018_vm12, %v1015_v33, %v990_v6  ;;  %vm1300_vm12 = vcmp.lt.s32.totalorder %v2303_v16, 512  ;;  %vm1299_vm0 = vcmp.lt.s32.totalorder %v2301_v15, 512 }
 0x1e5   : > { %vm1020_vm9 = vcmp.lt.s32.totalorder %v1017_v34, %v992_v8  ;;  %vm1022_vm7 = vcmp.lt.s32.totalorder %v1019_v35, %v994_v9  ;;  %vm2652_vm2 = vcmp.eq.f32.partialorder %v2090_v50, %v2299_v14  ;;  %vm1083_vm5 = vcmask 1040384  }
 0x1e6   : > { %v1021_v2 = vsel %vm1020_vm9, %v1017_v34, %v992_v8  ;;  %v1023_v20 = vsel %vm1022_vm7, %v1019_v35, %v994_v9  ;;  %v977_v59 = vsel %vm2652_vm2, %v2222_v30, 128  ;;  %vm2653_vm9 = vcmp.eq.f32.partialorder %v2105_v0, %v2299_v14 }
 0x1e7   : > { %vm1024_vm15 = vcmp.lt.s32.totalorder %v1021_v2, %v996_v58  ;;  %vm1026_vm13 = vcmp.lt.s32.totalorder %v1023_v20, %v998_v1  ;;  %v979_v48 = vsel %vm2653_vm9, %v2225_v32, 128  ;;  %vm2654_vm6 = vcmp.eq.f32.partialorder %v2116_v19, %v2299_v14 }
 0x1e8   : > { %v1025_v21 = vsel %vm1024_vm15, %v1021_v2, %v996_v58  ;;  %v1027_v22 = vsel %vm1026_vm13, %v1023_v20, %v998_v1  ;;  %v981_v62 = vsel %vm2654_vm6, %v2229_v36, 128  ;;  %vm2424_vm15 = vcmp.lt.s32.totalorder %v923_v4, 256 }
 0x1e9   : > { %vm1028_vm1 = vcmp.lt.s32.totalorder %v1025_v21, %v1000_v28  ;;  %vm1030_vm7 = vcmp.lt.s32.totalorder %v1027_v22, %v1002_v5  ;;  %vm2657_vm2 = vcmp.eq.f32.partialorder %v2125_v31, %v2299_v14  ;;  %v989_v63 = vsel %vm957_vm8, %v2242_v44, 128 }
 0x1ea   : > { %v1029_v47 = vsel %vm1028_vm1, %v1025_v21, %v1000_v28  ;;  %v1031_v61 = vsel %vm1030_vm7, %v1027_v22, %v1002_v5  ;;  %v983_v50 = vsel %vm2657_vm2, %v2232_v37, 128  ;;  %vm2658_vm1 = vcmp.eq.f32.partialorder %v2134_v41, %v2299_v14 }
 0x1eb   : > { %vm1032_vm13 = vcmp.lt.s32.totalorder %v1029_v47, %v1031_v61  ;;  %v985_v0 = vsel %vm2658_vm1, %v2235_v39, 128  ;;  %vm2659_vm7 = vcmp.eq.f32.partialorder %v2143_v55, %v2299_v14  ;;  %vm1043_vm9 = vcmp.lt.s32.totalorder %v973_v26, %v977_v59 }
 0x1ec   : > { %v987_v19 = vsel %vm2659_vm7, %v2239_v40, 128  ;;  %v1033_v4 = vsel %vm1032_vm13, %v1029_v47, %v1031_v61  ;;  %vm1045_vm6 = vcmp.lt.s32.totalorder %v975_v42, %v979_v48  ;;  %vm2660_vm2 = vcmp.eq.f32.partialorder %v2161_v25, %v2299_v14 }
 0x1ed   : > { %v1034_v31 = vrot.slane %v1033_v4, 4  ;;  %v991_v41 = vsel %vm2660_vm2, %v2245_v45, 128  ;;  %v1044_v17 = vsel %vm1043_vm9, %v973_v26, %v977_v59  ;;  %v1046_v6 = vsel %vm1045_vm6, %v975_v42, %v979_v48 }
 0x1ee   : > { %vm2661_vm1 = vcmp.eq.f32.partialorder %v2170_v38, %v2299_v14  ;;  %vm1047_vm13 = vcmp.lt.s32.totalorder %v1044_v17, %v981_v62  ;;  %vm1049_vm7 = vcmp.lt.s32.totalorder %v1046_v6, %v983_v50  ;;  %v1302_v7 = vmax.f32 %v2299_v14, 0.0 }
 0x1ef   : > { %v993_v55 = vsel %vm2661_vm1, %v2248_v46, 128  ;;  %vm1035_vm8 = vcmp.lt.s32.totalorder %v1033_v4, %v1034_v31  ;;  %v1048_v8 = vsel %vm1047_vm13, %v1044_v17, %v981_v62  ;;  %v1050_v9 = vsel %vm1049_vm7, %v1046_v6, %v983_v50 }
 0x1f0   : > { %v1301_v10 = vmax.f32 %v2250_v51, 0.0  ;;  %v1036_v11 = vsel %vm1035_vm8, %v1033_v4, %v1034_v31  ;;  %v995_v25 = vsel %vm963_vm10, %v2253_v52, 128  ;;  %vm1051_vm9 = vcmp.lt.s32.totalorder %v1048_v8, %v985_v0 }
 0x1f1   : > { %vm1053_vm6 = vcmp.lt.s32.totalorder %v1050_v9, %v987_v19  ;;  %v1037_v38 = vrot.slane %v1036_v11, 2  ;;  %v1052_v12 = vsel %vm1051_vm9, %v1048_v8, %v985_v0  ;;  %v1304_v23 = vsel %vm1300_vm12, %v1302_v7, 0.0 }
 0x1f2   : > { %v1054_v13 = vsel %vm1053_vm6, %v1050_v9, %v987_v19  ;;  %v997_v33 = vsel %vm965_vm14, %v2256_v54, 128  ;;  %vm1055_vm2 = vcmp.lt.s32.totalorder %v1052_v12, %v989_v63  ;;  %v1307_v53 = vrot.slane %v1304_v23, 7 }
 0x1f3   : > { %vm1057_vm1 = vcmp.lt.s32.totalorder %v1054_v13, %v991_v41  ;;  %vm1038_vm10 = vcmp.lt.s32.totalorder %v1036_v11, %v1037_v38  ;;  %v1056_v51 = vsel %vm1055_vm2, %v1052_v12, %v989_v63  ;;  %v1303_v35 = vsel %vm1299_vm0, %v1301_v10, 0.0 }
 0x1f4   : > { %v1058_v34 = vsel %vm1057_vm1, %v1054_v13, %v991_v41  ;;  %v1039_v16 = vsel %vm1038_vm10, %v1036_v11, %v1037_v38  ;;  %vm1059_vm12 = vcmp.lt.s32.totalorder %v1056_v51, %v993_v55  ;;  %v1308_v58 = vsel %vm1083_vm5, %v1303_v35, %v1307_v53 }
 0x1f5   : > { %vm1061_vm13 = vcmp.lt.s32.totalorder %v1058_v34, %v995_v25  ;;  %v1040_v18 = vrot.slane %v1039_v16, 1  ;;  %v999_v1 = vsel %vm967_vm11, %v2259_v56, 128  ;;  %v1060_v2 = vsel %vm1059_vm12, %v1056_v51, %v993_v55  ;;  %1310 = vst.msk [vmem:[%s357_s16] sm:$0x3] %vm2424_vm15, %v1308_v58  ;;  %s1396_s16 = sshll.u32 %s1392_s13, 4  ;;  %s1397_s16 = int_to_ptr.hbm [resolvable:$true] %s1396_s16 }
 0x1f6   : > { %v1062_v20 = vsel %vm1061_vm13, %v1058_v34, %v995_v25  ;;  %v1001_v15 = vsel %vm969_vm3, %v2262_v57, 128  ;;  %v1003_v28 = vsel %vm971_vm4, %v2297_v3, 128  ;;  %vm1063_vm14 = vcmp.lt.s32.totalorder %v1060_v2, %v997_v33  ;;  %s1689_s23 = sshra.s32 %s1397_s16, 4  ;;  %s1690_s23 = int_to_ptr.hbm [resolvable:$true] %s1689_s23 }
 0x1f7   : > { %vm1065_vm0 = vcmp.lt.s32.totalorder %v1062_v20, %v999_v1  ;;  %vm1041_vm7 = vcmp.lt.s32.totalorder %v1039_v16, %v1040_v18  ;;  %v1064_v29 = vsel %vm1063_vm14, %v1060_v2, %v997_v33  ;;  %v1740_v43 = vmov 1.0   ;;  %s1691_s27 = scalar_lea.hbm %s1690_s23, 2  ;;  %p1696_p0 = scmp.lt.s32.totalorder %s1690_s23, %s2640_s8 }
 0x1f8   : > { %v1066_v5 = vsel %vm1065_vm0, %v1062_v20, %v999_v1  ;;  %v2485_v21 = vsel %vm1041_vm7, %v1039_v16, %v1040_v18  ;;  %vm1067_vm11 = vcmp.lt.s32.totalorder %v1064_v29, %v1001_v15  ;;  %p1692_p11 = scmp.ne.s32.totalorder %s1690_s23, %s1691_s27  ;;  %p1697_p1 = scmp.lt.s32.totalorder %s1695_s2, %s1691_s27 }
 0x1f9   : > { %vm1069_vm8 = vcmp.lt.s32.totalorder %v1066_v5, %v1003_v28  ;;  %v1068_v22 = vsel %vm1067_vm11, %v1064_v29, %v1001_v15  ;;  %vm1120_vm9 = vcmp.eq.s32.totalorder %v2297_v3, %v2485_v21  ;;  %vm1118_vm4 = vcmp.eq.s32.totalorder %v2262_v57, %v2485_v21 }
 0x1fa   : > { %v1070_v26 = vsel %vm1069_vm8, %v1066_v5, %v1003_v28  ;;  %1589 = vmatpush.msk.msrb.mxu0 %vm1120_vm9, %v1740_v43  ;;  %vm1116_vm6 = vcmp.eq.s32.totalorder %v2259_v56, %v2485_v21  ;;  %vm1114_vm1 = vcmp.eq.s32.totalorder %v2256_v54, %v2485_v21  ;;  %vm1112_vm10 = vcmp.eq.s32.totalorder %v2253_v52, %v2485_v21  ;;  %p1693_p12 = pnand %p1692_p11, %p1829_p5  ;;  %p1698_p2 = por %p1697_p1, %p1696_p0 }
 0x1fb   : > { %vm1071_vm3 = vcmp.lt.s32.totalorder %v1068_v22, %v1070_v26  ;;  %vm1110_vm13 = vcmp.eq.s32.totalorder %v2248_v46, %v2485_v21  ;;  %vm1108_vm14 = vcmp.eq.s32.totalorder %v2245_v45, %v2485_v21  ;;  %vm1106_vm7 = vcmp.eq.s32.totalorder %v2242_v44, %v2485_v21 }
 0x1fc   : > { %v1072_v60 = vsel %vm1071_vm3, %v1068_v22, %v1070_v26  ;;  %1590 = vmatpush.msk.msrb.mxu0 %vm1118_vm4, %v1740_v43  ;;  %vm1104_vm8 = vcmp.eq.s32.totalorder %v2239_v40, %v2485_v21  ;;  %vm1102_vm4 = vcmp.eq.s32.totalorder %v2235_v39, %v2485_v21  ;;  %p1694_p13 = pneg %p1693_p12 }
 0x1fd   : > { %v1073_v14 = vrot.slane %v1072_v60, 4 }
 0x1fe   : > { %1591 = vmatpush.msk.msrb.mxu0 %vm1116_vm6, %v1740_v43  ;;  %p1699_p3 = pnand %p1698_p2, %p1694_p13 }
 0x1ff   : > { %vm1074_vm2 = vcmp.lt.s32.totalorder %v1072_v60, %v1073_v14 }
 0x200   : > { %v1075_v42 = vsel %vm1074_vm2, %v1072_v60, %v1073_v14  ;;  %1592 = vmatpush.msk.msrb.mxu0 %vm1114_vm1, %v1740_v43 }
 0x201   : > { %v1076_v59 = vrot.slane %v1075_v42, 2 }
 0x202   : > { %1593 = vmatpush.msk.msrb.mxu0 %vm1112_vm10, %v1740_v43 }
 0x203   : > { %vm1077_vm12 = vcmp.lt.s32.totalorder %v1075_v42, %v1076_v59 }
 0x204   : > { %v1078_v48 = vsel %vm1077_vm12, %v1075_v42, %v1076_v59  ;;  %1594 = vmatpush.msk.msrb.mxu0 %vm1110_vm13, %v1740_v43  ;;  %vm1100_vm12 = vcmp.eq.s32.totalorder %v2232_v37, %v2485_v21 }
 0x205   : > { %v1079_v47 = vrot.slane %v1078_v48, 1 }
 0x206   : > { %1595 = vmatpush.msk.msrb.mxu0 %vm1108_vm14, %v1740_v43  ;;  %vm1098_vm14 = vcmp.eq.s32.totalorder %v2229_v36, %v2485_v21 }
 0x207   : > { %vm1080_vm0 = vcmp.lt.s32.totalorder %v1078_v48, %v1079_v47 }
 0x208   : > { %v1081_v61 = vsel %vm1080_vm0, %v1078_v48, %v1079_v47  ;;  %1596 = vmatpush.msk.msrb.mxu0 %vm1106_vm7, %v1740_v43 }
 0x209   : > { %vm1121_vm11 = vcmp.eq.s32.totalorder %v2297_v3, %v1081_v61  ;;  %vm1119_vm9 = vcmp.eq.s32.totalorder %v2262_v57, %v1081_v61  ;;  %vm1099_vm3 = vcmp.eq.s32.totalorder %v2229_v36, %v1081_v61  ;;  %vm1097_vm6 = vcmp.eq.s32.totalorder %v2225_v32, %v1081_v61 }
 0x20a   : > { %1605 = vmatpush.msk.msrb.mxu1 %vm1121_vm11, %v1740_v43  ;;  %1597 = vmatpush.msk.msrb.mxu0 %vm1104_vm8, %v1740_v43  ;;  %vm1095_vm2 = vcmp.eq.s32.totalorder %v2222_v30, %v1081_v61  ;;  %vm1093_vm1 = vcmp.eq.s32.totalorder %v2219_v24, %v1081_v61  ;;  %vm1117_vm10 = vcmp.eq.s32.totalorder %v2259_v56, %v1081_v61  ;;  %v1082_v57 = vrot.slane %v1081_v61, 7 }
 0x20b   : > { %vm1115_vm13 = vcmp.eq.s32.totalorder %v2256_v54, %v1081_v61  ;;  %vm1113_vm0 = vcmp.eq.s32.totalorder %v2253_v52, %v1081_v61  ;;  %v1218_v54 = vpop.trf.xlu2  ;;  %vm1111_vm7 = vcmp.eq.s32.totalorder %v2248_v46, %v1081_v61  ;;  %vm1094_vm11 = vcmp.eq.s32.totalorder %v2222_v30, %v2485_v21 }
 0x20c   : > { %1606 = vmatpush.msk.msrb.mxu1 %vm1119_vm9, %v1740_v43  ;;  %1598 = vmatpush.msk.msrb.mxu0 %vm1102_vm4, %v1740_v43  ;;  %v1084_v3 = vsel %vm1083_vm5, %v2485_v21, %v1082_v57  ;;  %vm1096_vm5 = vcmp.eq.s32.totalorder %v2225_v32, %v2485_v21  ;;  %vm1092_vm8 = vcmp.eq.s32.totalorder %v2219_v24, %v2485_v21 }
 0x20d   : > { %1089 = vst.msk [vmem:[%s334_s21] sm:$0x3] %vm2424_vm15, %v1084_v3  ;;  %vm1109_vm15 = vcmp.eq.s32.totalorder %v2245_v45, %v1081_v61  ;;  %vm1107_vm9 = vcmp.eq.s32.totalorder %v2242_v44, %v1081_v61  ;;  %vm1090_vm4 = vcmp.eq.s32.totalorder %v2216_v27, %v2485_v21 }
 0x20e   : > { %1607 = vmatpush.msk.msrb.mxu1 %vm1117_vm10, %v1740_v43  ;;  %1599 = vmatpush.msk.msrb.mxu0 %vm1100_vm12, %v1740_v43  ;;  %vm1105_vm10 = vcmp.eq.s32.totalorder %v2239_v40, %v1081_v61  ;;  %vm1103_vm12 = vcmp.eq.s32.totalorder %v2235_v39, %v1081_v61 }
 0x210   : > { %1608 = vmatpush.msk.msrb.mxu1 %vm1115_vm13, %v1740_v43  ;;  %1600 = vmatpush.msk.msrb.mxu0 %vm1098_vm14, %v1740_v43  ;;  %vm1101_vm13 = vcmp.eq.s32.totalorder %v2232_v37, %v1081_v61  ;;  %vm1091_vm14 = vcmp.eq.s32.totalorder %v2216_v27, %v1081_v61  ;;  %v1311_v27 = vld [vmem:[%s2637_s5] sm:$0x7] }
 0x212   : > { %1609 = vmatpush.msk.msrb.mxu1 %vm1113_vm0, %v1740_v43  ;;  %1601 = vmatpush.msk.msrb.mxu0 %vm1096_vm5, %v1740_v43 }
 0x213   : > { %v1219_v45 = vpop.trf.xlu2 }
 0x214   : > { %1610 = vmatpush.msk.msrb.mxu1 %vm1111_vm7, %v1740_v43  ;;  %1602 = vmatpush.msk.msrb.mxu0 %vm1094_vm11, %v1740_v43 }
 0x216   : > { %1611 = vmatpush.msk.msrb.mxu1 %vm1109_vm15, %v1740_v43  ;;  %1603 = vmatpush.msk.msrb.mxu0 %vm1092_vm8, %v1740_v43 }
 0x218   : > { %1612 = vmatpush.msk.msrb.mxu1 %vm1107_vm9, %v1740_v43  ;;  %1604 = vmatpush.msk.msrb.mxu0 %vm1090_vm4, %v1740_v43 }
 0x219   : > { %1250 = vmatmul.f32.vlgmr.msrb.gmra.mxu0 %v1218_v54 }
 0x21a   : > { %1613 = vmatpush.msk.msrb.mxu1 %vm1105_vm10, %v1740_v43 }
 0x21b   : > { %v1220_v39 = vpop.trf.xlu2 }
 0x21c   : > { %1614 = vmatpush.msk.msrb.mxu1 %vm1103_vm12, %v1740_v43 }
 0x21e   : > { %1615 = vmatpush.msk.msrb.mxu1 %vm1101_vm13, %v1740_v43 }
 0x220   : > { %1616 = vmatpush.msk.msrb.mxu1 %vm1099_vm3, %v1740_v43  ;;  %vm2662_vm3 = vcmask 261120  }
 0x221   : > { %1253 = vmatmul.f32.gmra.mxu0 %v1219_v45 }
 0x222   : > { %1617 = vmatpush.msk.msrb.mxu1 %vm1097_vm6, %v1740_v43  ;;  %vm2663_vm6 = vmmov %vm2662_vm3 }
 0x223   : > { %v1221_v36 = vpop.trf.xlu2 }
 0x224   : > { %1618 = vmatpush.msk.msrb.mxu1 %vm1095_vm2, %v1740_v43 }
 0x226   : > { %1619 = vmatpush.msk.msrb.mxu1 %vm1093_vm1, %v1740_v43 }
 0x228   : > { %1620 = vmatpush.msk.msrb.mxu1 %vm1091_vm14, %v1740_v43 }
 0x229   : > { %1279 = vmatmul.f32.vlgmr.msrb.gmra.mxu1 %v1218_v54  ;;  %1256 = vmatmul.f32.gmra.mxu0 %v1220_v39 }
 0x231   : > { %1282 = vmatmul.f32.gmra.mxu1 %v1219_v45  ;;  %1259 = vmatmul.f32.gmra.mxu0 %v1221_v36 }
 0x239   : > { %1285 = vmatmul.f32.gmra.mxu1 %v1220_v39 }
 0x241   : > { %1288 = vmatmul.f32.gmra.mxu1 %v1221_v36 }
 0x296   : > { %v1251_v32 = vpop.f32.mrf.mxu0 }
 0x29e   : > { %v1254_v37 = vpop.f32.mrf.mxu0 }
 0x2a6   : > { %v1280_v30 = vpop.f32.mrf.mxu1  ;;  %v1257_v40 = vpop.f32.mrf.mxu0 }
 0x2ae   : > { %v1283_v44 = vpop.f32.mrf.mxu1  ;;  %v1260_v24 = vpop.f32.mrf.mxu0 }
 0x2af   : > { %1333 = vmatpush.msra.mxu0 %v1260_v24 }
 0x2b1   : > { %1334 = vmatpush.msra.mxu0 %v1257_v40 }
 0x2b3   : > { %1335 = vmatpush.msra.mxu0 %v1254_v37 }
 0x2b5   : > { %1336 = vmatpush.msra.mxu0 %v1251_v32 }
 0x2b6   : > { %v1286_v46 = vpop.f32.mrf.mxu1  ;;  %1622 = vmatmul.msk.f32.vlgmr.msra.gmra.mxu0 %vm2662_vm3, %v1311_v27 }
 0x2be   : > { %v1289_v52 = vpop.f32.mrf.mxu1 }
 0x2bf   : > { %1353 = vmatpush.msra.mxu1 %v1289_v52 }
 0x2c1   : > { %1354 = vmatpush.msra.mxu1 %v1286_v46 }
 0x2c3   : > { %1355 = vmatpush.msra.mxu1 %v1283_v44 }
 0x2c5   : > { %1356 = vmatpush.msra.mxu1 %v1280_v30 }
 0x2c6   : > { %1623 = vmatmul.msk.f32.vlgmr.msra.gmra.mxu1 %vm2663_vm6, %v1311_v27 }
 0x2c7   : > { %1702 = shalt.err (!%p1699_p3)
}
 0x2c8   : > { %1631 = dma.vmem_to_hbm [thread:$0]  (%p1829_p5), %s1395_s29, 32, %s1397_s16, %s1374_s22   ;;  %v1316_v56 = vpop.permute.xlu0 %1315  ;;  %vm1364_vm2 = vcmask 1043456  }
 0x2c9   : > { %s2664_s0 = sshll.u32 %s1850_s26, 2 }
 0x2ca   : > { %s351_s14 = scalar_lea.vmem %s2639_s7, %s2664_s0 }
 0x333   : > { %v1338_v62 = vpop.f32.mrf.mxu0 }
 0x334   : > { %v1339_v0 = vadd.f32 %v1338_v62, %v1316_v56 }
 0x343   : > { %v1358_v49 = vpop.f32.mrf.mxu1 }
 0x344   : > { %v1359_v50 = vadd.f32 %v1358_v49, %v1316_v56 }
 0x346   : > { %v1363_v19 = vrot.slane %v1359_v50, 4 }
 0x348   : > { %v1365_v4 = vsel %vm1364_vm2, %v1339_v0, %v1363_v19 }
 0x349   : > { %1367 = vst [vmem:[%s351_s14] sm:$0x77] %v1365_v4 }
 0x34a PF: > { %p1637_p4 = scmp.ge.s32.totalorder %s1737_s12, 2  ;;  %s1420_s2 = sand.u32 1, %s1725_s30  }
 0x34b   : > { %s1421_s19 = scalar_lea.sflag [#allocation3], %s1420_s2 }
 0x34c   : > { %p1634_p5 = pnand %p1637_p4, %p1833_p6 }
 0x34e   : > { %p1635_p7 = pneg %p1634_p5 }
 0x350   : > { %1720 = dma.done.wait (%p1635_p7), %s1421_s19, 32  }
 0x351   : > { %1722 = vsyncadd (%p1635_p7), %s1421_s19, 4294967264  ;;  %p20_p8 = scmp.ge.s32.totalorder %s1816_s15, 4   ;;  %s2665_s30 = smov %s1729_s10 }
 0x352   : > { %s2666_s10 = smov %s1733_s11  ;;  %s2667_s11 = smov %s1827_s18 }
 0x353   : > { %s2668_s12 = smov %s1816_s15  ;;  %22 = sbr.rel (!%p20_p8) target bundleno = 7 (0x7), region = 107 }
 0x358   :  { %1434 = vsyncpa [#allocation3], 1 }
 0x359   :  { %1436 = vsyncpa [#allocation3 + $0x1], 1 }

</bundles_post_ra>
